<compile_context>
chip_gen: v7x
topology: tpu7x:2x2x1
jax: 0.10.0
libtpu: 0.0.40
codegen_flags: <defaults>
</compile_context>

<pallas_src>
import functools

import jax
import jax.numpy as jnp
from jax.experimental import pallas as pl
from jax.experimental.pallas import tpu as pltpu


def _round_up(x, m):
    return ((x + m - 1) // m) * m


def _choose_tm(m):
    # >=2 grid steps whenever possible so a v7x chip can shard the "parallel"
    # row axis across both TensorCores; cap at 512 rows (measured ~= 1024 at
    # the HBM roofline with half the VMEM / live-intermediate pressure).
    return min(512, _round_up(max((m + 1) // 2, 8), 8))


# ----------------------------------------------------------------------------
# Pallas kernel: split-input layer 0 -> (Linear+ReLU)* -> Linear+Tanh
# ----------------------------------------------------------------------------
def _make_mlp_kernel(n_layers):
    """refs = (items, state, W0_items, W0_state, b0, [W_l, b_l]*, out)."""

    def kernel(*refs):
        items_ref, state_ref = refs[0], refs[1]
        out_ref = refs[-1]

        w0i = refs[2][...]
        w0s = refs[3][...]
        b0 = refs[4][...]

        # Layer 0: split matmul on the MXU (the all-zero "not-click" item's
        # weight rows were dropped outside the kernel -- exact).  Activations
        # arrive as f32 from HBM and are cast to the matmul dtype in-register
        # (free VPU work under the MXU); accumulation stays f32.
        h = (
            jnp.dot(items_ref[...].astype(w0i.dtype), w0i,
                    preferred_element_type=jnp.float32)
            + jnp.dot(state_ref[...].astype(w0s.dtype), w0s,
                      preferred_element_type=jnp.float32)
            + b0
        )
        h = jnp.maximum(h, 0.0)

        for layer in range(1, n_layers):
            w = refs[3 + 2 * layer][...]
            b = refs[4 + 2 * layer][...]
            h = jnp.dot(h.astype(w.dtype), w, preferred_element_type=jnp.float32) + b
            if layer < n_layers - 1:
                h = jnp.maximum(h, 0.0)   # hidden layers: ReLU
            else:
                h = jnp.tanh(h)           # output layer: Tanh (EUP)

        out_ref[...] = h.astype(out_ref.dtype)

    return kernel


def mlp_forward(items, state, w0_items, w0_state, b0, rest_ws, rest_bs):
    """items: [M, Fi] f32, state: [M, Fs] f32. Returns [M, output_size] f32."""
    M, Fi = items.shape
    _, Fs = state.shape
    H = w0_items.shape[-1]
    O = rest_ws[-1].shape[-1]          # true output_size (no lane padding)
    n_layers = 1 + len(rest_ws)

    tm = _choose_tm(M)
    grid = (pl.cdiv(M, tm),)           # ragged last tile handled by Pallas masking

    in_specs = [
        pl.BlockSpec((tm, Fi), lambda i: (i, 0)),
        pl.BlockSpec((tm, Fs), lambda i: (i, 0)),
        pl.BlockSpec(w0_items.shape, lambda i: (0, 0)),   # resident across steps
        pl.BlockSpec(w0_state.shape, lambda i: (0, 0)),
        pl.BlockSpec(b0.shape, lambda i: (0, 0)),
    ]
    args = [items, state, w0_items, w0_state, b0]
    for w, b in zip(rest_ws, rest_bs):
        in_specs.append(pl.BlockSpec(w.shape, lambda i: (0, 0)))
        in_specs.append(pl.BlockSpec(b.shape, lambda i: (0, 0)))
        args.extend([w, b])
    # Output block: full (unpadded) last dim == array dim, so this is legal;
    # the masked vst is accepted in exchange for a 32x smaller HBM writeback.
    out_spec = pl.BlockSpec((tm, O), lambda i: (i, 0))

    # VMEM budget: assume default 2x buffering on every spec (incl. resident
    # weights) plus live f32 intermediates and compiler-scratch headroom.
    # Never set below the usual scoped default so we only ever raise the limit.
    budget = 2 * tm * (Fi + Fs) * 4 + 2 * tm * O * 4
    for a in args[2:]:
        budget += 2 * int(a.size) * a.dtype.itemsize
    budget += 4 * tm * H * 4        # live f32 intermediates (generous)
    budget += 8 << 20               # headroom for compiler scratch/spills
    vmem_limit = int(min(64 << 20, max(32 << 20, budget)))

    # Advisory cost estimate for XLA scheduling around the call.
    flops = 2 * M * (Fi + Fs) * H
    for w in rest_ws:
        flops += 2 * M * w.shape[0] * w.shape[1]
    bytes_accessed = (
        M * (Fi + Fs) * 4            # f32 activation reads
        + M * O * 4                  # f32 output writes (exact width)
        + sum(int(a.size) * a.dtype.itemsize for a in args[2:])
    )

    fn = pl.pallas_call(
        _make_mlp_kernel(n_layers),
        out_shape=jax.ShapeDtypeStruct((M, O), jnp.float32),
        grid_spec=pltpu.PrefetchScalarGridSpec(
            num_scalar_prefetch=0,
            grid=grid,
            in_specs=in_specs,
            out_specs=out_spec,
        ),
        compiler_params=pltpu.CompilerParams(
            dimension_semantics=("parallel",),
            vmem_limit_bytes=vmem_limit,
        ),
        cost_estimate=pl.CostEstimate(
            flops=int(flops),
            transcendentals=int(M * O),   # tanh on the output tile
            bytes_accessed=int(bytes_accessed),
        ),
    )
    return fn(*args)


# ----------------------------------------------------------------------------
# Parameter init (PyTorch-style Linear init), hidden padded to 128 lanes,
# output kept at its true width, layer-0 split into item/state halves.
# ----------------------------------------------------------------------------
def init_discriminator_params(
    key, num_items, feat_dim, state_dim, output_size, n_hidden, hidden_dim,
    matmul_dtype=jnp.bfloat16,
):
    input_size = (num_items + 1) * feat_dim + state_dim  # incl. zero "not-click" item
    H = _round_up(hidden_dim, 128)

    def linear_init(k, fan_in, fan_out):
        kw, kb = jax.random.split(k)
        bound = 1.0 / jnp.sqrt(float(fan_in))
        w = jax.random.uniform(kw, (fan_in, fan_out), jnp.float32, -bound, bound)
        b = jax.random.uniform(kb, (fan_out,), jnp.float32, -bound, bound)
        return w, b

    keys = jax.random.split(key, n_hidden + 1)

    # Layer 0: Linear(input_size, hidden_dim); ordering matches the PyTorch
    # forward: [items (num_items*feat), zero "not-click" item (feat), state].
    w0, b0 = linear_init(keys[0], input_size, hidden_dim)
    n_item_feat = num_items * feat_dim
    w0_items = jnp.pad(w0[:n_item_feat],
                       ((0, 0), (0, H - hidden_dim))).astype(matmul_dtype)
    w0_state = jnp.pad(w0[(num_items + 1) * feat_dim:],
                       ((0, 0), (0, H - hidden_dim))).astype(matmul_dtype)
    b0p = jnp.pad(b0, (0, H - hidden_dim)).reshape(1, H)

    rest_ws, rest_bs = [], []
    for l in range(1, n_hidden):  # hidden -> hidden layers
        w, b = linear_init(keys[l], hidden_dim, hidden_dim)
        rest_ws.append(
            jnp.pad(w, ((0, H - hidden_dim), (0, H - hidden_dim))).astype(matmul_dtype)
        )
        rest_bs.append(jnp.pad(b, (0, H - hidden_dim)).reshape(1, H))

    # Final layer: Linear(hidden_dim, output_size) -- NOT lane padded, so the
    # kernel output is exactly output_size columns wide.
    wf, bf = linear_init(keys[n_hidden], hidden_dim, output_size)
    rest_ws.append(jnp.pad(wf, ((0, H - hidden_dim), (0, 0))).astype(matmul_dtype))
    rest_bs.append(bf.reshape(1, output_size))

    return {
        "w0_items": w0_items,
        "w0_state": w0_state,
        "b0": b0p,
        "ws": tuple(rest_ws),
        "bs": tuple(rest_bs),
    }


# ----------------------------------------------------------------------------
# Forward glue: no HBM concat, no wrapper cast/pad/slice (reshape only).
# ----------------------------------------------------------------------------
@jax.jit
def discriminator_forward(state, displayed_items, params):
    """
    state:           [batch, num_time_steps, state_dim]            float32
    displayed_items: [batch, num_time_steps, num_items, feat_dim]  float32
    returns:         [batch, num_time_steps, output_size]          float32
    """
    # TODO(synk): PackedSequence unpacking has no Pallas equivalent; inputs are
    # assumed to be the already-padded dense tensors.
    B, T, state_dim = state.shape
    _, _, num_items, feat_dim = displayed_items.shape
    M = B * T

    items_flat = displayed_items.reshape(M, num_items * feat_dim)  # no-copy reshape
    state_flat = state.reshape(M, state_dim)

    out = mlp_forward(
        items_flat, state_flat,
        params["w0_items"], params["w0_state"], params["b0"],
        list(params["ws"]), list(params["bs"]),
    )
    return out.reshape(B, T, out.shape[-1])


# ----------------------------------------------------------------------------
# Pure-JAX reference for a numerical sanity check (bf16 matmul drift expected).
# ----------------------------------------------------------------------------
def reference_forward(state, displayed_items, params):
    B, T, _ = state.shape
    _, _, N, F = displayed_items.shape
    x_items = displayed_items.reshape(B, T, N * F).astype(jnp.float32)
    x_state = state.astype(jnp.float32)
    h = (x_items @ params["w0_items"].astype(jnp.float32)
         + x_state @ params["w0_state"].astype(jnp.float32)
         + params["b0"])
    h = jnp.maximum(h, 0.0)
    ws, bs = params["ws"], params["bs"]
    for i, (w, b) in enumerate(zip(ws, bs)):
        h = h @ w.astype(jnp.float32) + b
        if i < len(ws) - 1:
            h = jnp.maximum(h, 0.0)
        else:
            h = jnp.tanh(h)
    return h


if __name__ == "__main__":
    # Small, deterministic example shapes.
    batch = 2
    num_time_steps = 8
    num_displayed_items = 3
    feature_dim = 4
    state_dim = 6
    n_hidden = 2
    hidden_dim = 32
    output_size = num_displayed_items + 1

    key = jax.random.PRNGKey(0)
    k_params, k_state, k_items = jax.random.split(key, 3)

    params = init_discriminator_params(
        k_params,
        num_items=num_displayed_items,
        feat_dim=feature_dim,
        state_dim=state_dim,
        output_size=output_size,
        n_hidden=n_hidden,
        hidden_dim=hidden_dim,
    )

    state = jax.random.normal(
        k_state, (batch, num_time_steps, state_dim), dtype=jnp.float32
    )
    displayed_items = jax.random.normal(
        k_items,
        (batch, num_time_steps, num_displayed_items, feature_dim),
        dtype=jnp.float32,
    )

    reward = discriminator_forward(state, displayed_items, params)
    reward = jax.block_until_ready(reward)

    assert reward.shape == (batch, num_time_steps, output_size), reward.shape
    assert bool(jnp.all(jnp.isfinite(reward)))
    # Tanh output must lie in [-1, 1].
    assert bool(jnp.all(jnp.abs(reward) <= 1.0 + 1e-6))

    # Numerical sanity check vs. pure-JAX reference (bf16 matmul drift allowed).
    ref = reference_forward(state, displayed_items, params)
    max_err = float(jnp.max(jnp.abs(reward - ref)))
    assert max_err < 5e-2, f"max abs error vs reference too large: {max_err}"

    print("KERNEL_OK")
</pallas_src>

<mosaic_0001>
module attributes {stable_mosaic.version = 11 : i64} {
  func.func @kernel(%arg0: i32, %arg1: memref<8x12xf32, #tpu.memory_space<vmem>>, %arg2: memref<8x6xf32, #tpu.memory_space<vmem>>, %arg3: memref<12x128xbf16, #tpu.memory_space<vmem>>, %arg4: memref<6x128xbf16, #tpu.memory_space<vmem>>, %arg5: memref<1x128xf32, #tpu.memory_space<vmem>>, %arg6: memref<128x128xbf16, #tpu.memory_space<vmem>>, %arg7: memref<1x128xf32, #tpu.memory_space<vmem>>, %arg8: memref<128x4xbf16, #tpu.memory_space<vmem>>, %arg9: memref<1x4xf32, #tpu.memory_space<vmem>>, %arg10: memref<8x4xf32, #tpu.memory_space<vmem>>) attributes {dimension_semantics = [#tpu.dimension_semantics<parallel>], iteration_bounds = array<i64: 2>, scalar_prefetch = 0 : i64, scratch_operands = 0 : i64, tpu.core_type = #tpu.core_type<tc>, window_params = [{transform_indices = @transform_0, window_bounds = array<i64: 8, 12>}, {transform_indices = @transform_1, window_bounds = array<i64: 8, 6>}, {pipeline_mode = #tpu.pipeline_mode<synchronous>, transform_indices = @transform_2, window_bounds = array<i64: 12, 128>}, {pipeline_mode = #tpu.pipeline_mode<synchronous>, transform_indices = @transform_3, window_bounds = array<i64: 6, 128>}, {pipeline_mode = #tpu.pipeline_mode<synchronous>, transform_indices = @transform_4, window_bounds = array<i64: 1, 128>}, {pipeline_mode = #tpu.pipeline_mode<synchronous>, transform_indices = @transform_5, window_bounds = array<i64: 128, 128>}, {pipeline_mode = #tpu.pipeline_mode<synchronous>, transform_indices = @transform_6, window_bounds = array<i64: 1, 128>}, {pipeline_mode = #tpu.pipeline_mode<synchronous>, transform_indices = @transform_7, window_bounds = array<i64: 128, 4>}, {pipeline_mode = #tpu.pipeline_mode<synchronous>, transform_indices = @transform_8, window_bounds = array<i64: 1, 4>}, {transform_indices = @transform_9, window_bounds = array<i64: 8, 4>}]} {
    %c0 = arith.constant 0 : index
    %c0_0 = arith.constant 0 : index
    %0 = vector.load %arg3[%c0, %c0_0] : memref<12x128xbf16, #tpu.memory_space<vmem>>, vector<12x128xbf16>
    %c0_1 = arith.constant 0 : index
    %c0_2 = arith.constant 0 : index
    %1 = vector.load %arg4[%c0_1, %c0_2] : memref<6x128xbf16, #tpu.memory_space<vmem>>, vector<6x128xbf16>
    %c0_3 = arith.constant 0 : index
    %c0_4 = arith.constant 0 : index
    %2 = vector.load %arg5[%c0_3, %c0_4] : memref<1x128xf32, #tpu.memory_space<vmem>>, vector<1x128xf32>
    %c0_5 = arith.constant 0 : index
    %c0_6 = arith.constant 0 : index
    %3 = vector.load %arg1[%c0_5, %c0_6] : memref<8x12xf32, #tpu.memory_space<vmem>>, vector<8x12xf32>
    %4 = arith.truncf %3 : vector<8x12xf32> to vector<8x12xbf16>
    %cst = arith.constant dense<0.000000e+00> : vector<8x128xf32>
    %5 = tpu.matmul %4, %0, %cst {dimension_numbers = #tpu.dot_dimension_numbers<[1], [0], [0], [1], [0, 0, 1, 1], [], []>} : vector<8x12xbf16>, vector<12x128xbf16>, vector<8x128xf32> -> vector<8x128xf32>
    %c0_7 = arith.constant 0 : index
    %c0_8 = arith.constant 0 : index
    %6 = vector.load %arg2[%c0_7, %c0_8] : memref<8x6xf32, #tpu.memory_space<vmem>>, vector<8x6xf32>
    %7 = arith.truncf %6 : vector<8x6xf32> to vector<8x6xbf16>
    %cst_9 = arith.constant dense<0.000000e+00> : vector<8x128xf32>
    %8 = tpu.matmul %7, %1, %cst_9 {dimension_numbers = #tpu.dot_dimension_numbers<[1], [0], [0], [1], [0, 0, 1, 1], [], []>} : vector<8x6xbf16>, vector<6x128xbf16>, vector<8x128xf32> -> vector<8x128xf32>
    %9 = arith.addf %5, %8 : vector<8x128xf32>
    %10 = vector.broadcast %2 : vector<1x128xf32> to vector<8x128xf32>
    %11 = arith.addf %9, %10 : vector<8x128xf32>
    %cst_10 = arith.constant 0.000000e+00 : f32
    %12 = vector.broadcast %cst_10 : f32 to vector<8x128xf32>
    %13 = arith.maximumf %11, %12 : vector<8x128xf32>
    %c0_11 = arith.constant 0 : index
    %c0_12 = arith.constant 0 : index
    %14 = vector.load %arg6[%c0_11, %c0_12] : memref<128x128xbf16, #tpu.memory_space<vmem>>, vector<128x128xbf16>
    %c0_13 = arith.constant 0 : index
    %c0_14 = arith.constant 0 : index
    %15 = vector.load %arg7[%c0_13, %c0_14] : memref<1x128xf32, #tpu.memory_space<vmem>>, vector<1x128xf32>
    %16 = arith.truncf %13 : vector<8x128xf32> to vector<8x128xbf16>
    %cst_15 = arith.constant dense<0.000000e+00> : vector<8x128xf32>
    %17 = tpu.matmul %16, %14, %cst_15 {dimension_numbers = #tpu.dot_dimension_numbers<[1], [0], [0], [1], [0, 0, 1, 1], [], []>} : vector<8x128xbf16>, vector<128x128xbf16>, vector<8x128xf32> -> vector<8x128xf32>
    %18 = vector.broadcast %15 : vector<1x128xf32> to vector<8x128xf32>
    %19 = arith.addf %17, %18 : vector<8x128xf32>
    %cst_16 = arith.constant 0.000000e+00 : f32
    %20 = vector.broadcast %cst_16 : f32 to vector<8x128xf32>
    %21 = arith.maximumf %19, %20 : vector<8x128xf32>
    %c0_17 = arith.constant 0 : index
    %c0_18 = arith.constant 0 : index
    %22 = vector.load %arg8[%c0_17, %c0_18] : memref<128x4xbf16, #tpu.memory_space<vmem>>, vector<128x4xbf16>
    %c0_19 = arith.constant 0 : index
    %c0_20 = arith.constant 0 : index
    %23 = vector.load %arg9[%c0_19, %c0_20] : memref<1x4xf32, #tpu.memory_space<vmem>>, vector<1x4xf32>
    %24 = arith.truncf %21 : vector<8x128xf32> to vector<8x128xbf16>
    %cst_21 = arith.constant dense<0.000000e+00> : vector<8x4xf32>
    %25 = tpu.matmul %24, %22, %cst_21 {dimension_numbers = #tpu.dot_dimension_numbers<[1], [0], [0], [1], [0, 0, 1, 1], [], []>} : vector<8x128xbf16>, vector<128x4xbf16>, vector<8x4xf32> -> vector<8x4xf32>
    %26 = vector.broadcast %23 : vector<1x4xf32> to vector<8x4xf32>
    %27 = arith.addf %25, %26 : vector<8x4xf32>
    %28 = math.tanh %27 : vector<8x4xf32>
    %c0_22 = arith.constant 0 : index
    %c0_23 = arith.constant 0 : index
    %29 = vector.load %arg10[%c0_22, %c0_23] : memref<8x4xf32, #tpu.memory_space<vmem>>, vector<8x4xf32>
    tpu.vector_store %arg10[%c0_22, %c0_23], %28 {strides = array<i32>} : memref<8x4xf32, #tpu.memory_space<vmem>>, vector<8x4xf32>,
    return
  }
  func.func @transform_0(%arg0: i32) -> (i32, i32) {
    %c0_i32 = arith.constant 0 : i32
    %c0_i32_0 = arith.constant 0 : i32
    return %arg0, %c0_i32 : i32, i32
  }
  func.func @transform_1(%arg0: i32) -> (i32, i32) {
    %c0_i32 = arith.constant 0 : i32
    %c0_i32_0 = arith.constant 0 : i32
    return %arg0, %c0_i32 : i32, i32
  }
  func.func @transform_2(%arg0: i32) -> (i32, i32) {
    %c0_i32 = arith.constant 0 : i32
    %c0_i32_0 = arith.constant 0 : i32
    %c0_i32_1 = arith.constant 0 : i32
    return %c0_i32, %c0_i32_0 : i32, i32
  }
  func.func @transform_3(%arg0: i32) -> (i32, i32) {
    %c0_i32 = arith.constant 0 : i32
    %c0_i32_0 = arith.constant 0 : i32
    %c0_i32_1 = arith.constant 0 : i32
    return %c0_i32, %c0_i32_0 : i32, i32
  }
  func.func @transform_4(%arg0: i32) -> (i32, i32) {
    %c0_i32 = arith.constant 0 : i32
    %c0_i32_0 = arith.constant 0 : i32
    %c0_i32_1 = arith.constant 0 : i32
    return %c0_i32, %c0_i32_0 : i32, i32
  }
  func.func @transform_5(%arg0: i32) -> (i32, i32) {
    %c0_i32 = arith.constant 0 : i32
    %c0_i32_0 = arith.constant 0 : i32
    %c0_i32_1 = arith.constant 0 : i32
    return %c0_i32, %c0_i32_0 : i32, i32
  }
  func.func @transform_6(%arg0: i32) -> (i32, i32) {
    %c0_i32 = arith.constant 0 : i32
    %c0_i32_0 = arith.constant 0 : i32
    %c0_i32_1 = arith.constant 0 : i32
    return %c0_i32, %c0_i32_0 : i32, i32
  }
  func.func @transform_7(%arg0: i32) -> (i32, i32) {
    %c0_i32 = arith.constant 0 : i32
    %c0_i32_0 = arith.constant 0 : i32
    %c0_i32_1 = arith.constant 0 : i32
    return %c0_i32, %c0_i32_0 : i32, i32
  }
  func.func @transform_8(%arg0: i32) -> (i32, i32) {
    %c0_i32 = arith.constant 0 : i32
    %c0_i32_0 = arith.constant 0 : i32
    %c0_i32_1 = arith.constant 0 : i32
    return %c0_i32, %c0_i32_0 : i32, i32
  }
  func.func @transform_9(%arg0: i32) -> (i32, i32) {
    %c0_i32 = arith.constant 0 : i32
    %c0_i32_0 = arith.constant 0 : i32
    return %arg0, %c0_i32 : i32, i32
  }
}

</mosaic_0001>

<bundles_post_ra>
// kernel: discriminator_forward.1
= control target key start
LH: loop header
LB: loop body
LE: loop exit
PB: predicated region body
PF: predicated region fallthrough
CT: control target
= control target key end

     0   :  { %s951_s30 = smov 0   ;;  %s1065_s0 = inlined_call_operand.vmem [shape: f32[16,12], index: 0, kind: input, shape index: {}]   ;;  %s1066_s1 = inlined_call_operand.vmem [shape: f32[16,6], index: 1, kind: input, shape index: {}]   ;;  %s1067_s2 = inlined_call_operand.vmem [shape: bf16[12,128], index: 2, kind: input, shape index: {}]   ;;  %s1068_s3 = inlined_call_operand.vmem [shape: bf16[6,128], index: 3, kind: input, shape index: {}]   ;;  %s1069_s4 = inlined_call_operand.vmem [shape: f32[1,128], index: 4, kind: input, shape index: {}]   ;;  %s1070_s5 = inlined_call_operand.vmem [shape: bf16[128,128], index: 5, kind: input, shape index: {}]   ;;  %s1071_s6 = inlined_call_operand.vmem [shape: f32[1,128], index: 6, kind: input, shape index: {}]   ;;  %s1072_s7 = inlined_call_operand.vmem [shape: bf16[128,4], index: 7, kind: input, shape index: {}]   ;;  %s1073_s8 = inlined_call_operand.vmem [shape: f32[1,4], index: 8, kind: input, shape index: {}]   ;;  %s1074_s9 = inlined_call_operand.vmem [shape: f32[16,4], index: 9, kind: output, shape index: {}]  }
   0x1 LB: > { %s756_s10 = sadd.s32 4294967295, %s897_s30   ;;  %p760_p0 = scmp.ge.s32.totalorder %s897_s30, 1  ;;  %s897_s30 = sphi %s951_s30, %s19_s30  }
   0x2   : > { %p295_p1 = scmp.lt.s32.totalorder %s897_s30, 3 }
   0x4   : > { %p296_p2 = pnand %p760_p0, %p295_p1 }
   0x5   : > { %v348_v0 = vld [vmem:[%s1068_s3] sm:$0x7] (!%p296_p2)  ;;  %vm358_vm0 = vcmask (!%p296_p2), 1042432   ;;  %v899_v1 = vmov (!%p296_p2), 0.0   ;;  %vm411_vm1 = vcmask (!%p296_p2), 1045504   ;;  %p333_p3 = scmp.lt.s32.totalorder (!%p296_p2), %s756_s10, 1 }
   0x6   : > { %299 = sbr.rel (%p296_p2) target bundleno = 684 (0x2ac), region = 56  ;;  %810 = vmatprep.subr.bf16.mxu0 (!%p296_p2), %v899_v1  ;;  %816 = vmatprep.subr.bf16.mxu1 (!%p296_p2), %v899_v1  ;;  %v360_v2 = vsel (!%p296_p2), %vm358_vm0, %v348_v0, 0  ;;  %v872_v3 = vld [vmem:[%s1067_s2] sm:$0x3f] (!%p296_p2)   ;;  %vm900_vm2 = vmmov (!%p296_p2), 0   ;;  %vm354_vm3 = vcmask (!%p296_p2), 48128  }
   0x7   : > { %811 = vmatpush3.bf16.msra.mxu0 (!%p296_p2), %v360_v2  ;;  %v413_v4 = vsel (!%p296_p2), %vm411_vm1, %v872_v3, 0  ;;  %812 = vmatprep.mubr.msk.bf16.mxu0 (!%p296_p2), %vm900_vm2, %v899_v1  ;;  %v873_v6 = vld [vmem:[%s1070_s5] sm:$0xff] (!%p296_p2)   ;;  %vm407_vm4 = vcmask (!%p296_p2), 97280   ;;  %v874_v10 = vld [vmem:[%s1070_s5 + $0x8] sm:$0xff] (!%p296_p2)   ;;  %v875_v11 = vld [vmem:[%s1070_s5 + $0x10] sm:$0xff] (!%p296_p2)   ;;  %vm689_vm5 = vcmask (!%p296_p2), 31744  }
   0x8   : > { %818 = vmatprep.mubr.msk.bf16.mxu1 (!%p296_p2), %vm900_vm2, %v899_v1  ;;  %817 = vmatpush3.bf16.msra.mxu1 (!%p296_p2), %v413_v4  ;;  %v876_v12 = vld [vmem:[%s1070_s5 + $0x18] sm:$0xff] (!%p296_p2)   ;;  %v877_v13 = vld [vmem:[%s1070_s5 + $0x20] sm:$0xff] (!%p296_p2)   ;;  %v878_v14 = vld [vmem:[%s1070_s5 + $0x28] sm:$0xff] (!%p296_p2)  }
   0x9   : > { %822 = vmatprep.subr.bf16.mxu0 (!%p296_p2), %v899_v1  ;;  %842 = vmatprep.subr.bf16.mxu1 (!%p296_p2), %v899_v1  ;;  %v879_v15 = vld [vmem:[%s1070_s5 + $0x30] sm:$0xff] (!%p296_p2)   ;;  %v880_v16 = vld [vmem:[%s1070_s5 + $0x38] sm:$0xff] (!%p296_p2)   ;;  %v881_v17 = vld [vmem:[%s1072_s7] sm:$0xff] (!%p296_p2)  }
   0xa   : > { %v882_v18 = vld [vmem:[%s1072_s7 + $0x8] sm:$0xff] (!%p296_p2)   ;;  %v883_v19 = vld [vmem:[%s1072_s7 + $0x10] sm:$0xff] (!%p296_p2)   ;;  %v884_v20 = vld [vmem:[%s1072_s7 + $0x18] sm:$0xff] (!%p296_p2)  }
   0xb   : > { %v885_v21 = vld [vmem:[%s1072_s7 + $0x20] sm:$0xff] (!%p296_p2)   ;;  %v886_v22 = vld [vmem:[%s1072_s7 + $0x28] sm:$0xff] (!%p296_p2)   ;;  %v887_v36 = vld [vmem:[%s1072_s7 + $0x30] sm:$0xff] (!%p296_p2)  }
   0xc   : > { %v767_v24 = vld [vmem:[%s1069_s4] ss:$0 sm:$0xff] (!%p296_p2)  ;;  %v888_v37 = vld [vmem:[%s1072_s7 + $0x38] sm:$0xff] (!%p296_p2)  }
   0xd   : > { %s1076_s10 = smov (!%p333_p3, %s756_s10), 1  ;;  %v768_v38 = vld [vmem:[%s1071_s6] ss:$0 sm:$0xff] }
   0xe   : > { %s973_s15 = sshll.u32 %s1076_s10, 3  ;;  %v777_v46 = vld [vmem:[%s1073_s8] ss:$0 sm:$0xff] }
   0xf   : > { %s340_s18 = scalar_lea.vmem %s1066_s1, %s973_s15  ;;  %s336_s21 = scalar_lea.vmem %s1065_s0, %s973_s15 }
  0x10   : > { %v352_v5 = vld [vmem:[%s340_s18] sm:$0xff]  ;;  %s344_s24 = scalar_lea.vmem %s1074_s9, %s973_s15 }
  0x11   : > { %v353_v7 = vpack.c.bf16 %v352_v5, %v352_v5  ;;  %v350_v8 = vld [vmem:[%s336_s21] sm:$0xff] }
  0x12   : > { %v351_v9 = vpack.c.bf16 %v350_v8, %v350_v8 }
  0x13   : > { %813 = vmatmul.mubr.msk.bf16.vlgmr.msra.gmra.mrb[0].mxu0 %vm354_vm3, %v353_v7 }
  0x14   : > { %819 = vmatmul.mubr.msk.bf16.vlgmr.msra.gmra.mrb[0].mxu1 %vm407_vm4, %v351_v9  ;;  %823 = vmatpush3.bf16.msra.mxu0 %v873_v6 }
  0x15   : > { %824 = vmatprep.subr.bf16.mxu0 %v899_v1  ;;  %838 = vmatprep.mubr.msk.bf16.mxu0 %vm900_vm2, %v899_v1 }
  0x16   : > { %858 = vmatprep.mubr.msk.bf16.mxu1 %vm900_vm2, %v899_v1  ;;  %843 = vmatpush3.bf16.msra.mxu1 %v881_v17 }
  0x17   : > { %844 = vmatprep.subr.bf16.mxu1 %v899_v1 }
  0x18   : > { %825 = vmatpush3.bf16.msra.mxu0 %v874_v10 }
  0x19   : > { %826 = vmatprep.subr.bf16.mxu0 %v899_v1 }
  0x1a   : > { %845 = vmatpush3.bf16.msra.mxu1 %v882_v18 }
  0x1b   : > { %846 = vmatprep.subr.bf16.mxu1 %v899_v1 }
  0x1c   : > { %827 = vmatpush3.bf16.msra.mxu0 %v875_v11 }
  0x1d   : > { %828 = vmatprep.subr.bf16.mxu0 %v899_v1 }
  0x1e   : > { %847 = vmatpush3.bf16.msra.mxu1 %v883_v19 }
  0x1f   : > { %848 = vmatprep.subr.bf16.mxu1 %v899_v1 }
  0x20   : > { %829 = vmatpush3.bf16.msra.mxu0 %v876_v12 }
  0x21   : > { %830 = vmatprep.subr.bf16.mxu0 %v899_v1 }
  0x22   : > { %849 = vmatpush3.bf16.msra.mxu1 %v884_v20 }
  0x23   : > { %850 = vmatprep.subr.bf16.mxu1 %v899_v1 }
  0x24   : > { %831 = vmatpush3.bf16.msra.mxu0 %v877_v13 }
  0x25   : > { %832 = vmatprep.subr.bf16.mxu0 %v899_v1 }
  0x26   : > { %851 = vmatpush3.bf16.msra.mxu1 %v885_v21 }
  0x27   : > { %852 = vmatprep.subr.bf16.mxu1 %v899_v1 }
  0x28   : > { %833 = vmatpush3.bf16.msra.mxu0 %v878_v14 }
  0x29   : > { %834 = vmatprep.subr.bf16.mxu0 %v899_v1 }
  0x2a   : > { %853 = vmatpush3.bf16.msra.mxu1 %v886_v22 }
  0x2b   : > { %854 = vmatprep.subr.bf16.mxu1 %v899_v1 }
  0x2c   : > { %835 = vmatpush3.bf16.msra.mxu0 %v879_v15 }
  0x2d   : > { %836 = vmatprep.subr.bf16.mxu0 %v899_v1 }
  0x2e   : > { %855 = vmatpush3.bf16.msra.mxu1 %v887_v36 }
  0x2f   : > { %856 = vmatprep.subr.bf16.mxu1 %v899_v1 }
  0x30   : > { %837 = vmatpush3.bf16.msra.mxu0 %v880_v16 }
  0x32   : > { %857 = vmatpush3.bf16.msra.mxu1 %v888_v37 }
  0xe6   : > { %v396_v23 = vpop.f32.mrb[0].mxu0 }
  0xe7   : > { %v449_v25 = vpop.f32.mrb[0].mxu1  ;;  %v814_v26 = vpop.f32.mrb[1].mxu0 }
  0xe8   : > { %v450_v27 = vadd.f32 %v449_v25, %v396_v23  ;;  %v820_v28 = vpop.f32.mrb[1].mxu1  ;;  %v399_v29 = vpop.f32.mrb[2].mxu0 }
  0xe9   : > { %v452_v30 = vpop.f32.mrb[2].mxu1  ;;  %v815_v31 = vpop.f32.mrb[3].mxu0 }
  0xea   : > { %v461_v32 = vadd.f32 %v767_v24, %v450_v27  ;;  %v821_v33 = vpop.f32.mrb[3].mxu1 }
  0xec   : > { %v462_v34 = vmax.f32 %v461_v32, 0.0 }
  0xee   : > { %v480_v35 = vpack.c.bf16 %v462_v34, %v462_v34 }
  0xf0   : > { %839 = vmatmul.mubr.bf16.vlgmr.msra.gmra.mrb[4].mxu0 %v480_v35 }
 0x1c3   : > { %v569_v39 = vpop.f32.mrb[4].mxu0 }
 0x1c4   : > { %v570_v40 = vadd.f32 %v768_v38, %v569_v39  ;;  %v840_v41 = vpop.f32.mrb[5].mxu0 }
 0x1c5   : > { %v572_v42 = vpop.f32.mrb[6].mxu0 }
 0x1c6   : > { %v575_v43 = vmax.f32 %v570_v40, 0.0  ;;  %v841_v44 = vpop.f32.mrb[7].mxu0 }
 0x1c8   : > { %v593_v45 = vpack.c.bf16 %v575_v43, %v575_v43 }
 0x1ca   : > { %859 = vmatmul.mubr.bf16.vlgmr.msra.gmra.mrb[4].mxu1 %v593_v45 }
 0x29d   : > { %v682_v47 = vpop.f32.mrb[4].mxu1 }
 0x29e   : > { %v683_v48 = vadd.f32 %v777_v46, %v682_v47  ;;  %v860_v49 = vpop.f32.mrb[5].mxu1 }
 0x29f   : > { %v685_v50 = vpop.f32.mrb[6].mxu1 }
 0x2a0   : > { %889 = vtanh.f32 %v683_v48  ;;  %v861_v51 = vpop.f32.mrb[7].mxu1 }
 0x2aa   : > { %v890_v52 = vpop.eup %889 }
 0x2ab   : > { %690 = vst.msk [vmem:[%s344_s24] sm:$0xff] %vm689_vm5, %v890_v52 }
 0x2ac PF: > { %s19_s30 = sadd.s32 1, %s897_s30  }
 0x2ad   : > { %p16_p4 = scmp.ge.s32.totalorder %s19_s30, 4  }
 0x2af   :  { %18 = sbr.rel (!%p16_p4) target bundleno = 1 (0x1), region = 89 }

</bundles_post_ra>
